<compile_context>
chip_gen: v5e
topology: v5e:2x2
jax: 0.10.0
libtpu: 0.0.40
codegen_flags: <defaults>
</compile_context>

<pallas_src>
import functools

import jax
import jax.numpy as jnp
from jax import lax
from jax.experimental import pallas as pl
from jax.experimental.pallas import tpu as pltpu

EPS = 1e-10


def _round_up(x, m):
    return ((x + m - 1) // m) * m


def _vmem_need(tq, n_col, d, out_bytes, mm_bytes):
    """Approximate per-step VMEM footprint (bytes), incl. f32 temporaries."""
    return (2 * tq * n_col * out_bytes          # output double buffer
            + 3 * tq * n_col * 4                # f32 temps: M, e, e*scale
            + 2 * n_col * d * mm_bytes          # hk double buffer (resident)
            + 2 * tq * d * mm_bytes             # hq double buffer
            + 4 * (tq + n_col) * 4)             # mask buffers + slack


def _pick_tq(n_col, d, out_bytes, mm_bytes, budget):
    """Largest row tile in {512, 256, 128} that fits the VMEM budget."""
    for tq in (512, 256, 128):
        if tq > max(n_col, 128):                # don't exceed the problem size
            continue
        if _vmem_need(tq, n_col, d, out_bytes, mm_bytes) <= budget:
            return tq
    return 128


def _adjacency_kernel(hq_ref, hk_ref, rowm_ref, colm_ref, out_ref, *,
                      approx_recip=True, stabilize=False):
    # Block shapes:
    #   hq_ref  : (1, TQ, D)   row block of h
    #   hk_ref  : (1, Nc, D)   first Nc (column-padded) rows of h; constant
    #                          across the q axis -> resident, DMA'd once per b
    #   rowm_ref: (1, TQ, 1)   node mask, row layout (f32)
    #   colm_ref: (1, 1,  Nc)  node mask, column layout (f32)
    #   out_ref : (1, TQ, Nc)
    hq = hq_ref[0]              # (TQ, D), bf16 (or f32)
    hk = hk_ref[0]              # (Nc, D)
    row_mask = rowm_ref[0]      # (TQ, 1) f32
    col_mask = colm_ref[0]      # (1, Nc) f32

    # raw_matrix: dot-product adjacency  M = h @ h^T  (row block x all nodes).
    # Contract the last dims directly so the MXU is fed without an explicit
    # transpose of hk.
    # TODO(synk): `raw_matrix` is abstract in `_Adjacency`; the dot-product
    # form is the concrete "simple" instantiation implemented here.
    M = lax.dot_general(
        hq, hk,
        dimension_numbers=(((1,), (1,)), ((), ())),
        preferred_element_type=jnp.float32,
    )                                                  # (TQ, Nc) f32

    # symmetric=True: 0.5 * (M + M^T) is a bitwise no-op for M = h h^T
    # (identical products, identical accumulation order), so it is elided.
    # TODO(synk): re-enable if raw_matrix is ever replaced by a
    # non-symmetric form.

    if stabilize:
        # Optional numerical safety; NOT the module's exact formula (it
        # rescales the EPS term by exp(row max)). Off by default.
        M = M - jnp.max(M, axis=-1, keepdims=True)

    # Masked matrix softmax over the last dim (MATRIX_ACTIVATIONS['soft']).
    e = jnp.exp(M) * col_mask                          # mask BEFORE the sum
    denom = jnp.sum(e, axis=-1, keepdims=True) + EPS
    # Fold the row mask into the (TQ,1) reciprocal so only one full-tile
    # multiply remains (zeroes invalid rows for free).
    scale = row_mask * pl.reciprocal(denom, approx=approx_recip)
    out_ref[0] = (e * scale).astype(out_ref.dtype)


def adjacency_forward(h, node_mask, *, tq=None, use_bf16_matmul=True,
                      out_dtype=jnp.bfloat16, approx_recip=True,
                      stabilize=False):
    """Forward pass of the simple dot-product `_Adjacency`.

    h:         (B, N, D) float32 node embeddings.
    node_mask: (B, N)    float32/bool per-node validity (1 = real node).
               The original module's dense (B, N, N) mask is the outer
               product node_mask[:, :, None] * node_mask[:, None, :]; only the
               vector is streamed and the 2D mask is rebuilt in-kernel.
    returns:   (B, N, N) row-softmaxed adjacency in `out_dtype`
               (default bf16; softmax math is always f32).
    """
    B, N, D = h.shape
    assert node_mask.shape == (B, N)

    out_bytes = jnp.dtype(out_dtype).itemsize
    mm_dtype = jnp.bfloat16 if use_bf16_matmul else h.dtype
    mm_bytes = jnp.dtype(mm_dtype).itemsize

    # Column (lane) extent: multiple of 128 only -> lane-dense stores without
    # quadratic over-padding.
    n_col = _round_up(N, 128)

    # Per-generation VMEM budget (v5e/v6e: 128 MiB, v7x: 64 MiB per TC).
    try:
        vmem_phys = int(pltpu.get_tpu_info().vmem_capacity_bytes)
    except Exception:  # not on TPU / info unavailable: assume the small case
        vmem_phys = 64 << 20
    tile_budget = int(0.6 * vmem_phys)

    if tq is None:
        tq = _pick_tq(n_col, D, out_bytes, mm_bytes, tile_budget)
    n_row = _round_up(N, tq)
    num_q = n_row // tq

    need = _vmem_need(tq, n_col, D, out_bytes, mm_bytes)
    vmem_limit = int(min(int(0.95 * vmem_phys), max(need + (8 << 20), 32 << 20)))

    # Pad only when needed (avoid an extra HBM copy when N is aligned).
    h_mm = h.astype(mm_dtype)
    pad_r = n_row - N
    h_p = jnp.pad(h_mm, ((0, 0), (0, pad_r), (0, 0))) if pad_r else h_mm

    nm = node_mask.astype(jnp.float32)
    nm_row = jnp.pad(nm, ((0, 0), (0, pad_r))) if pad_r else nm
    pad_c = n_col - N
    nm_col = jnp.pad(nm, ((0, 0), (0, pad_c))) if pad_c else nm
    row_mask = nm_row[:, :, None]        # (B, n_row, 1)
    col_mask = nm_col[:, None, :]        # (B, 1, n_col)

    # Advisory cost estimate for the XLA scheduler.
    ce = pl.CostEstimate(
        flops=2 * B * n_row * n_col * D,
        transcendentals=B * n_row * n_col,
        bytes_accessed=(B * n_row * n_col * out_bytes
                        + B * (n_row + n_col) * D * mm_bytes
                        + B * (n_row + n_col) * 4),
    )

    kernel = functools.partial(_adjacency_kernel,
                               approx_recip=approx_recip, stabilize=stabilize)

    # Both grid axes are independent writes -> "parallel" (megacore sharding
    # on v7x picks up either axis; with B==1 it shards over num_q).
    out = pl.pallas_call(
        kernel,
        out_shape=jax.ShapeDtypeStruct((B, n_row, n_col), out_dtype),
        grid_spec=pltpu.PrefetchScalarGridSpec(
            num_scalar_prefetch=0,
            grid=(B, num_q),
            in_specs=[
                # Row block of h (h_p passed twice; the "column" stream below
                # is resident across q, so h is only read ~twice total, which
                # is negligible vs. the O(N^2) output writeback).
                pl.BlockSpec((1, tq, D), lambda b, q: (b, q, 0)),
                # First n_col (column-padded) rows of h, constant over q.
                pl.BlockSpec((1, n_col, D), lambda b, q: (b, 0, 0)),
                pl.BlockSpec((1, tq, 1), lambda b, q: (b, q, 0)),     # row mask
                pl.BlockSpec((1, 1, n_col), lambda b, q: (b, 0, 0)),  # col mask
            ],
            out_specs=pl.BlockSpec((1, tq, n_col), lambda b, q: (b, q, 0)),
        ),
        compiler_params=pltpu.CompilerParams(
            dimension_semantics=("parallel", "parallel"),
            vmem_limit_bytes=vmem_limit,
        ),
        cost_estimate=ce,
    )(h_p, h_p, row_mask, col_mask)

    return out[:, :N, :N]


def adjacency_reference(h, node_mask, use_bf16_matmul=True):
    """Plain-JAX reference with the original module's exact formula."""
    mm_dtype = jnp.bfloat16 if use_bf16_matmul else h.dtype
    hh = h.astype(mm_dtype)
    M = jnp.einsum("bnd,bmd->bnm", hh, hh, preferred_element_type=jnp.float32)
    M = 0.5 * (M + jnp.transpose(M, (0, 2, 1)))          # symmetric=True
    mask = node_mask[:, :, None] * node_mask[:, None, :]
    e = jnp.exp(M) * mask
    return e / (jnp.sum(e, axis=-1, keepdims=True) + EPS)


if __name__ == "__main__":
    key = jax.random.PRNGKey(0)
    B, N, D = 2, 8, 32

    k_h, _ = jax.random.split(key)
    h = jax.random.normal(k_h, (B, N, D), dtype=jnp.float32) * 0.1

    # Padding mask: first n_valid[b] nodes are real, the rest are padding.
    n_valid = jnp.array([8, 5], dtype=jnp.int32)
    node_mask = (jnp.arange(N)[None, :] < n_valid[:, None]).astype(jnp.float32)

    ref = adjacency_reference(h, node_mask)

    # Default (bf16 output) path.
    out_bf16 = adjacency_forward(h, node_mask)
    out_bf16 = jax.block_until_ready(out_bf16)
    assert out_bf16.shape == (B, N, N)
    assert out_bf16.dtype == jnp.bfloat16
    assert jnp.allclose(out_bf16.astype(jnp.float32), ref, atol=1.5e-2, rtol=1.5e-2), \
        "bf16 output mismatch vs reference"

    # f32 output path (tighter tolerance).
    out_f32 = adjacency_forward(h, node_mask, out_dtype=jnp.float32)
    out_f32 = jax.block_until_ready(out_f32)
    assert out_f32.shape == (B, N, N)
    assert jnp.allclose(out_f32, ref, atol=2e-3, rtol=2e-3), \
        "f32 output mismatch vs reference"

    print("KERNEL_OK")
</pallas_src>

<mosaic_0001>
module attributes {stable_mosaic.version = 11 : i64} {
  func.func @_adjacency_kernel(%arg0: i32, %arg1: i32, %arg2: memref<1x128x32xbf16, #tpu.memory_space<vmem>>, %arg3: memref<1x128x32xbf16, #tpu.memory_space<vmem>>, %arg4: memref<1x128x1xf32, #tpu.memory_space<vmem>>, %arg5: memref<1x1x128xf32, #tpu.memory_space<vmem>>, %arg6: memref<1x128x128xbf16, #tpu.memory_space<vmem>>) attributes {dimension_semantics = [#tpu.dimension_semantics<parallel>, #tpu.dimension_semantics<parallel>], iteration_bounds = array<i64: 2, 1>, scalar_prefetch = 0 : i64, scratch_operands = 0 : i64, tpu.core_type = #tpu.core_type<tc>, window_params = [{transform_indices = @transform_0, window_bounds = array<i64: 1, 128, 32>}, {transform_indices = @transform_1, window_bounds = array<i64: 1, 128, 32>}, {transform_indices = @transform_2, window_bounds = array<i64: 1, 128, 1>}, {transform_indices = @transform_3, window_bounds = array<i64: 1, 1, 128>}, {transform_indices = @transform_4, window_bounds = array<i64: 1, 128, 128>}]} {
    %c0 = arith.constant 0 : index
    %c0_0 = arith.constant 0 : index
    %c0_1 = arith.constant 0 : index
    %0 = vector.load %arg2[%c0, %c0_0, %c0_1] : memref<1x128x32xbf16, #tpu.memory_space<vmem>>, vector<1x128x32xbf16>
    %1 = vector.shape_cast %0 : vector<1x128x32xbf16> to vector<128x32xbf16>
    %c0_2 = arith.constant 0 : index
    %c0_3 = arith.constant 0 : index
    %c0_4 = arith.constant 0 : index
    %2 = vector.load %arg3[%c0_2, %c0_3, %c0_4] : memref<1x128x32xbf16, #tpu.memory_space<vmem>>, vector<1x128x32xbf16>
    %3 = vector.shape_cast %2 : vector<1x128x32xbf16> to vector<128x32xbf16>
    %c0_5 = arith.constant 0 : index
    %c0_6 = arith.constant 0 : index
    %c0_7 = arith.constant 0 : index
    %4 = vector.load %arg4[%c0_5, %c0_6, %c0_7] : memref<1x128x1xf32, #tpu.memory_space<vmem>>, vector<1x128x1xf32>
    %5 = vector.shape_cast %4 : vector<1x128x1xf32> to vector<128x1xf32>
    %c0_8 = arith.constant 0 : index
    %c0_9 = arith.constant 0 : index
    %c0_10 = arith.constant 0 : index
    %6 = vector.load %arg5[%c0_8, %c0_9, %c0_10] : memref<1x1x128xf32, #tpu.memory_space<vmem>>, vector<1x1x128xf32>
    %7 = vector.shape_cast %6 : vector<1x1x128xf32> to vector<1x128xf32>
    %cst = arith.constant dense<0.000000e+00> : vector<128x128xf32>
    %8 = tpu.matmul %1, %3, %cst {dimension_numbers = #tpu.dot_dimension_numbers<[1], [1], [0], [0], [0, 0, 1, 0], [], []>} : vector<128x32xbf16>, vector<128x32xbf16>, vector<128x128xf32> -> vector<128x128xf32>
    %9 = math.exp %8 : vector<128x128xf32>
    %10 = vector.broadcast %7 : vector<1x128xf32> to vector<128x128xf32>
    %11 = arith.mulf %9, %10 : vector<128x128xf32>
    %cst_11 = arith.constant dense<0.000000e+00> : vector<128xf32>
    %12 = vector.multi_reduction <add>, %11, %cst_11 [1] : vector<128x128xf32> to vector<128xf32>
    %13 = vector.shape_cast %12 : vector<128xf32> to vector<128x1xf32>
    %cst_12 = arith.constant 1.000000e-10 : f32
    %14 = vector.broadcast %cst_12 : f32 to vector<128x1xf32>
    %15 = arith.addf %13, %14 : vector<128x1xf32>
    %16 = tpu.reciprocal %15 {approx = true} : vector<128x1xf32> -> vector<128x1xf32>
    %17 = arith.mulf %5, %16 : vector<128x1xf32>
    %18 = vector.broadcast %17 : vector<128x1xf32> to vector<128x128xf32>
    %19 = arith.mulf %11, %18 : vector<128x128xf32>
    %20 = arith.truncf %19 : vector<128x128xf32> to vector<128x128xbf16>
    %c0_13 = arith.constant 0 : index
    %c0_14 = arith.constant 0 : index
    %c0_15 = arith.constant 0 : index
    %21 = vector.load %arg6[%c0_13, %c0_14, %c0_15] : memref<1x128x128xbf16, #tpu.memory_space<vmem>>, vector<1x128x128xbf16>
    %22 = vector.shape_cast %21 : vector<1x128x128xbf16> to vector<128x128xbf16>
    %23 = vector.shape_cast %20 : vector<128x128xbf16> to vector<1x128x128xbf16>
    tpu.vector_store %arg6[%c0_13, %c0_14, %c0_15], %23 {strides = array<i32>} : memref<1x128x128xbf16, #tpu.memory_space<vmem>>, vector<1x128x128xbf16>,
    return
  }
  func.func @transform_0(%arg0: i32, %arg1: i32) -> (i32, i32, i32) {
    %c0_i32 = arith.constant 0 : i32
    %c0_i32_0 = arith.constant 0 : i32
    return %arg0, %arg1, %c0_i32 : i32, i32, i32
  }
  func.func @transform_1(%arg0: i32, %arg1: i32) -> (i32, i32, i32) {
    %c0_i32 = arith.constant 0 : i32
    %c0_i32_0 = arith.constant 0 : i32
    %c0_i32_1 = arith.constant 0 : i32
    return %arg0, %c0_i32, %c0_i32_0 : i32, i32, i32
  }
  func.func @transform_2(%arg0: i32, %arg1: i32) -> (i32, i32, i32) {
    %c0_i32 = arith.constant 0 : i32
    %c0_i32_0 = arith.constant 0 : i32
    return %arg0, %arg1, %c0_i32 : i32, i32, i32
  }
  func.func @transform_3(%arg0: i32, %arg1: i32) -> (i32, i32, i32) {
    %c0_i32 = arith.constant 0 : i32
    %c0_i32_0 = arith.constant 0 : i32
    %c0_i32_1 = arith.constant 0 : i32
    return %arg0, %c0_i32, %c0_i32_0 : i32, i32, i32
  }
  func.func @transform_4(%arg0: i32, %arg1: i32) -> (i32, i32, i32) {
    %c0_i32 = arith.constant 0 : i32
    %c0_i32_0 = arith.constant 0 : i32
    return %arg0, %arg1, %c0_i32 : i32, i32, i32
  }
}

</mosaic_0001>

<bundles_post_ra>
// kernel: tpu_custom_call.1
= control target key start
LH: loop header
LB: loop body
LE: loop exit
PB: predicated region body
PF: predicated region fallthrough
CT: control target
= control target key end

     0   :  { %9 = vsyncpa [#allocation3], 0  ;;  %s1597_s0 = inlined_call_operand.vmem [shape: bf16[2,128,32], index: 0, kind: input, shape index: {}]   ;;  %s1598_s1 = inlined_call_operand.vmem [shape: bf16[2,128,32], index: 1, kind: input, shape index: {}]   ;;  %s1599_s2 = inlined_call_operand.vmem [shape: f32[2,128,1], index: 2, kind: input, shape index: {}]   ;;  %s1600_s3 = inlined_call_operand.vmem [shape: f32[2,1,128], index: 3, kind: input, shape index: {}]   ;;  %s1601_s4 = inlined_call_operand.hbm [shape: bf16[2,128,128], index: 4, kind: output, shape index: {}]  }
   0x1   :  { %11 = vsyncpa [#allocation3 + $0x1], 0  ;;  %s1333_s15 = smov 0   ;;  %s1335_s16 = smov 0  }
   0x2   :  { %s1337_s17 = smov 0   ;;  %s1339_s18 = smov 0  }
   0x3   :  { %s1341_s19 = smov 0   ;;  %s1343_s20 = smov 0  }
   0x4 LB: > { %s919_s21 = sadd.s32 4294967295, %s1303_s20   ;;  %s920_s22 = sadd.s32 4294967294, %s1303_s20   ;;  %s1303_s20 = sphi %s1343_s20, %s17_s20   ;;  %s1299_s19 = sphi %s1341_s19, %s1608_s19   ;;  %s1295_s18 = sphi %s1339_s18, %s1607_s18   ;;  %s1291_s17 = sphi %s1337_s17, %s1606_s17   ;;  %s1287_s16 = sphi %s1335_s16, %s1605_s16   ;;  %s1283_s15 = sphi %s1333_s15, %s1604_s15  }
   0x5   : > { %s29_s23 = sadd.s32 1, %s1299_s19  ;;  %s146_s24 = sadd.s32 1, %s1291_s17 }
   0x6   : > { %p31_p0 = scmp.ge.s32.totalorder %s29_s23, 2  ;;  %p156_p1 = scmp.ne.s32.totalorder %s1291_s17, %s1287_s16 }
   0x7   : > { %p157_p2 = scmp.eq.s32.totalorder %s919_s21, 1  ;;  %p162_p3 = scmp.ne.s32.totalorder %s1287_s16, %s1283_s15 }
   0x8   : > { %s1610_s23 = smov (%p31_p0, %s29_s23), 0  ;;  %p163_p5 = scmp.eq.s32.totalorder %s920_s22, 1 }
   0x9   : > { %p1373_p4 = por %p157_p2, %p156_p1  ;;  %s141_s26 = ssub.s32 %s1299_s19, %s1610_s23 }
   0xa   : > { %p923_p6 = scmp.ge.s32.totalorder %s1303_s20, 1  ;;  %p144_p7 = scmp.eq.s32.totalorder %s141_s26, 0 }
   0xb   : > { %p1380_p8 = por %p163_p5, %p162_p3  ;;  %p221_p9 = scmp.lt.s32.totalorder %s1303_s20, 3 }
   0xc   : > { %s1386_s28 = scalar_select %p144_p7, %s1291_s17, %s146_s24  }
   0xd   : > { %p222_p10 = pnand %p923_p6, %p221_p9 }
   0xe   : > { %p269_p11 = scmp.lt.s32.totalorder (!%p222_p10), %s1295_s18, 1  ;;  %s1245_s24 = scalar_lea.hbm (!%p222_p10), %s1601_s4, 128 }
   0xf   : > { %225 = sbr.rel (%p222_p10) target bundleno = 525 (0x20d), region = 36 }
  0x14   : > { %s1390_s29 = scalar_select %p269_p11, %s1295_s18, 1  ;;  %vm426_vm0 = vcmask 261120  }
  0x16   : > { %s1008_s30 = sshll.u32 %s1390_s29, 6  ;;  %s295_s7 = scalar_lea.vmem %s1600_s3, %s1390_s29 }
  0x17   : > { %s1402_s10 = scalar_lea.vmem %s1598_s1, %s1008_s30  ;;  %s276_s13 = scalar_lea.vmem %s1597_s0, %s1008_s30  ;;  %v1438_v28 = vld [vmem:[%s295_s7] ss:$0 sm:$0xff] }
  0x18   : > { %v1026_v0 = vld [vmem:[%s1402_s10 + $0x38] sm:$0xff]  ;;  %v1025_v2 = vld [vmem:[%s1402_s10 + $0x30] sm:$0xff]  ;;  %v1024_v4 = vld [vmem:[%s1402_s10 + $0x28] sm:$0xff]  ;;  %s1010_s22 = sshll.u32 %s1390_s29, 7  ;;  %s265_s29 = sand.u32 1, %s1287_s16  }
  0x19   : > { %v473_v1 = vsel %vm426_vm0, %v1026_v0, 0  ;;  %v470_v3 = vsel %vm426_vm0, %v1025_v2, 0  ;;  %v467_v5 = vsel %vm426_vm0, %v1024_v4, 0  ;;  %v1023_v6 = vld [vmem:[%s1402_s10 + $0x20] sm:$0xff]  ;;  %v1022_v8 = vld [vmem:[%s1402_s10 + $0x18] sm:$0xff]  ;;  %v1021_v10 = vld [vmem:[%s1402_s10 + $0x10] sm:$0xff]  ;;  %s1508_s30 = scalar_lea.vmem %s1599_s2, %s1010_s22 }
  0x1a   : > { %475 = vmatpush.bf16.xpose.msra.mxu0 %v473_v1  ;;  %1075 = vmatpush.bf16.xpose.msra.mxu1 %v473_v1  ;;  %v464_v7 = vsel %vm426_vm0, %v1023_v6, 0  ;;  %v461_v9 = vsel %vm426_vm0, %v1022_v8, 0  ;;  %v458_v11 = vsel %vm426_vm0, %v1021_v10, 0  ;;  %v1020_v12 = vld [vmem:[%s1402_s10 + $0x8] sm:$0xff]  ;;  %v1019_v14 = vld [vmem:[%s1402_s10] sm:$0xff]  ;;  %v1013_v17 = vld [vmem:[%s276_s13 + $0x10] sm:$0xff] }
  0x1b   : > { %1077 = vmatpush.bf16.xpose.msra.mxu3 %v473_v1  ;;  %1076 = vmatpush.bf16.xpose.msra.mxu2 %v473_v1  ;;  %v455_v13 = vsel %vm426_vm0, %v1020_v12, 0  ;;  %v452_v15 = vsel %vm426_vm0, %v1019_v14, 0  ;;  %v1011_v16 = vld [vmem:[%s276_s13] sm:$0xff]  ;;  %v1017_v18 = vld [vmem:[%s276_s13 + $0x30] sm:$0xff]  ;;  %v1012_v20 = vld [vmem:[%s276_s13 + $0x8] sm:$0xff]  ;;  %s924_s5 = sshll.u32 %s265_s29, 6 }
  0x1c   : > { %v1015_v19 = vld [vmem:[%s276_s13 + $0x20] sm:$0xff]  ;;  %v1014_v21 = vld [vmem:[%s276_s13 + $0x18] sm:$0xff]  ;;  %v1016_v22 = vld [vmem:[%s276_s13 + $0x28] sm:$0xff]  ;;  %s1534_s6 = scalar_lea.vmem [#allocation2], %s924_s5  ;;  %s1027_s7 = sshll.u32 %s1295_s18, 6 }
  0x1d   : > { %v1018_v23 = vld [vmem:[%s276_s13 + $0x38] sm:$0xff]  ;;  %s797_s10 = scalar_lea.hbm %s1601_s4, %s1027_s7  ;;  %s798_s11 = sshll.u32 %s1534_s6, 4  ;;  %s799_s11 = int_to_ptr.vmem [resolvable:$true] %s798_s11 }
  0x1e   : > { %s800_s12 = sshll.u32 %s797_s10, 4  ;;  %s784_s18 = scalar_lea.sflag [#allocation3], %s265_s29  ;;  %s801_s12 = int_to_ptr.hbm [resolvable:$true] %s800_s12 }
  0x1f   : > { %s1239_s13 = sshra.s32 %s801_s12, 4  ;;  %s1240_s13 = int_to_ptr.hbm [resolvable:$true] %s1239_s13 }
  0x20   : > { %s1241_s14 = scalar_lea.hbm %s1240_s13, 64  ;;  %p1246_p1 = scmp.lt.s32.totalorder %s1240_s13, %s1601_s4 }
  0x21   : > { %p1242_p12 = scmp.ne.s32.totalorder %s1240_s13, %s1241_s14  ;;  %p1247_p2 = scmp.lt.s32.totalorder %s1245_s24, %s1241_s14 }
  0x22   : > { %476 = vmatpush.bf16.xpose.msra.mxu0 %v470_v3  ;;  %1078 = vmatpush.bf16.xpose.msra.mxu1 %v470_v3 }
  0x23   : > { %1080 = vmatpush.bf16.xpose.msra.mxu3 %v470_v3  ;;  %1079 = vmatpush.bf16.xpose.msra.mxu2 %v470_v3  ;;  %p1243_p13 = pnand %p1242_p12, %p1373_p4  ;;  %p1248_p3 = por %p1247_p2, %p1246_p1 }
  0x25   : > { %p1244_p0 = pneg %p1243_p13 }
  0x27   : > { %p1249_p5 = pnand %p1248_p3, %p1244_p0 }
  0x2a   : > { %477 = vmatpush.bf16.xpose.msra.mxu0 %v467_v5  ;;  %1081 = vmatpush.bf16.xpose.msra.mxu1 %v467_v5 }
  0x2b   : > { %1083 = vmatpush.bf16.xpose.msra.mxu3 %v467_v5  ;;  %1082 = vmatpush.bf16.xpose.msra.mxu2 %v467_v5 }
  0x32   : > { %478 = vmatpush.bf16.xpose.msra.mxu0 %v464_v7  ;;  %1084 = vmatpush.bf16.xpose.msra.mxu1 %v464_v7 }
  0x33   : > { %1086 = vmatpush.bf16.xpose.msra.mxu3 %v464_v7  ;;  %1085 = vmatpush.bf16.xpose.msra.mxu2 %v464_v7 }
  0x3a   : > { %479 = vmatpush.bf16.xpose.msra.mxu0 %v461_v9  ;;  %1087 = vmatpush.bf16.xpose.msra.mxu1 %v461_v9 }
  0x3b   : > { %1089 = vmatpush.bf16.xpose.msra.mxu3 %v461_v9  ;;  %1088 = vmatpush.bf16.xpose.msra.mxu2 %v461_v9 }
  0x42   : > { %480 = vmatpush.bf16.xpose.msra.mxu0 %v458_v11  ;;  %1090 = vmatpush.bf16.xpose.msra.mxu1 %v458_v11 }
  0x43   : > { %1092 = vmatpush.bf16.xpose.msra.mxu3 %v458_v11  ;;  %1091 = vmatpush.bf16.xpose.msra.mxu2 %v458_v11 }
  0x4a   : > { %481 = vmatpush.bf16.xpose.msra.mxu0 %v455_v13  ;;  %1093 = vmatpush.bf16.xpose.msra.mxu1 %v455_v13 }
  0x4b   : > { %1095 = vmatpush.bf16.xpose.msra.mxu3 %v455_v13  ;;  %1094 = vmatpush.bf16.xpose.msra.mxu2 %v455_v13 }
  0x52   : > { %482 = vmatpush.bf16.xpose.msra.mxu0 %v452_v15  ;;  %1096 = vmatpush.bf16.xpose.msra.mxu1 %v452_v15 }
  0x53   : > { %1098 = vmatpush.bf16.xpose.msra.mxu3 %v452_v15  ;;  %1097 = vmatpush.bf16.xpose.msra.mxu2 %v452_v15 }
  0x59   : > { %995 = vmatmul.msk.bf16.vlgmr.msra.gmra.mxu0 %vm426_vm0, %v1011_v16  ;;  %997 = vmatmul.msk.bf16.vlgmr.msra.gmra.mxu1 %vm426_vm0, %v1013_v17 }
  0x5a   : > { %1001 = vmatmul.msk.bf16.vlgmr.msra.gmra.mxu3 %vm426_vm0, %v1017_v18  ;;  %999 = vmatmul.msk.bf16.vlgmr.msra.gmra.mxu2 %vm426_vm0, %v1015_v19 }
  0x69   : > { %996 = vmatmul.msk.bf16.gmra.mxu0 %vm426_vm0, %v1012_v20  ;;  %998 = vmatmul.msk.bf16.gmra.mxu1 %vm426_vm0, %v1014_v21 }
  0x6a   : > { %1000 = vmatmul.msk.bf16.gmra.mxu2 %vm426_vm0, %v1016_v22  ;;  %1002 = vmatmul.msk.bf16.gmra.mxu3 %vm426_vm0, %v1018_v23 }
  0xd6   : > { %v484_v24 = vpop.f32.mrf.mxu0  ;;  %v494_v25 = vpop.f32.mrf.mxu1 }
  0xd7   : > { %v524_v26 = vmul.f32 1.442695, %v484_v24  ;;  %v532_v27 = vmul.f32 1.442695, %v494_v25  ;;  %v1305_v25 = vmov 0  }
  0xd8   : > { %1157 = vset.pattern.permute.xlu1 %v1305_v25  ;;  %1158 = vset.pattern.permute.xlu0 %v1305_v25 }
  0xd9   : > { %1161 = vpow2.f32 %v524_v26  ;;  %1159 = vset.pattern.permute.xlu2 %v1305_v25  ;;  %v339_v25 = vld [vmem:[%s1508_s30 + $0x50] sm:$0xff] }
  0xda   : > { %1163 = vpow2.f32 %v532_v27 }
  0xdd   : > { %v514_v29 = vpop.f32.mrf.mxu3  ;;  %v504_v30 = vpop.f32.mrf.mxu2 }
  0xde   : > { %v548_v31 = vmul.f32 1.442695, %v514_v29  ;;  %v486_v32 = vpop.f32.mrf.mxu0  ;;  %v540_v34 = vmul.f32 1.442695, %v504_v30  ;;  %v496_v38 = vpop.f32.mrf.mxu1 }
  0xdf   : > { %v1162_v33 = vpop.eup %1161  ;;  %v526_v39 = vmul.f32 1.442695, %v486_v32  ;;  %v534_v40 = vmul.f32 1.442695, %v496_v38 }
  0xe0   : > { %v1164_v35 = vpop.eup %1163  ;;  %1165 = vpow2.f32 %v548_v31  ;;  %v1441_v36 = vmul.f32 %v1162_v33, %v1438_v28 }
  0xe1   : > { %v1444_v37 = vmul.f32 %v1164_v35, %v1438_v28  ;;  %1167 = vpow2.f32 %v540_v34 }
  0xe2   : > { %575 = vadd.xlane.f32.xlu0 %v1441_v36  ;;  %1169 = vpow2.f32 %v526_v39 }
  0xe3   : > { %583 = vadd.xlane.f32.xlu2 %v1444_v37 }
  0xe5   : > { %v516_v41 = vpop.f32.mrf.mxu3  ;;  %v506_v42 = vpop.f32.mrf.mxu2 }
  0xe6   : > { %v1166_v43 = vpop.eup %1165  ;;  %v550_v44 = vmul.f32 1.442695, %v516_v41  ;;  %v489_v45 = vpop.f32.mrf.mxu0  ;;  %v542_v50 = vmul.f32 1.442695, %v506_v42  ;;  %v341_v42 = vld [vmem:[%s1508_s30 + $0x60] sm:$0xff] }
  0xe7   : > { %v1449_v46 = vmul.f32 %v1166_v43, %v1438_v28  ;;  %v528_v47 = vmul.f32 1.442695, %v489_v45  ;;  %v1168_v48 = vpop.eup %1167  ;;  %v499_v58 = vpop.f32.mrf.mxu1 }
  0xe8   : > { %1171 = vpow2.f32 %v550_v44  ;;  %v1452_v49 = vmul.f32 %v1168_v48, %v1438_v28  ;;  %v1170_v51 = vpop.eup %1169  ;;  %v536_v61 = vmul.f32 1.442695, %v499_v58 }
  0xe9   : > { %1173 = vpow2.f32 %v534_v40  ;;  %v1460_v60 = vmul.f32 %v1170_v51, %v1438_v28  ;;  %v333_v40 = vld [vmem:[%s1508_s30 + $0x20] sm:$0xff] }
  0xea   : > { %599 = vadd.xlane.f32.xlu0 %v1449_v46  ;;  %1175 = vpow2.f32 %v528_v47 }
  0xeb   : > { %591 = vadd.xlane.f32.xlu2 %v1452_v49  ;;  %1177 = vpow2.f32 %v542_v50 }
  0xed   : > { %v509_v52 = vpop.f32.mrf.mxu2  ;;  %v519_v53 = vpop.f32.mrf.mxu3 }
  0xee   : > { %v1172_v54 = vpop.eup %1171  ;;  %v552_v55 = vmul.f32 1.442695, %v519_v53  ;;  %v544_v59 = vmul.f32 1.442695, %v509_v52  ;;  %v491_v3 = vpop.f32.mrf.mxu0  ;;  %v337_v53 = vld [vmem:[%s1508_s30 + $0x40] sm:$0xff] }
  0xef   : > { %v1174_v56 = vpop.eup %1173  ;;  %v1457_v57 = vmul.f32 %v1172_v54, %v1438_v28  ;;  %v530_v9 = vmul.f32 1.442695, %v491_v3  ;;  %v501_v16 = vpop.f32.mrf.mxu1 }
  0xf0   : > { %1179 = vpow2.f32 %v552_v55  ;;  %v1176_v62 = vpop.eup %1175  ;;  %v1464_v63 = vmul.f32 %v1174_v56, %v1438_v28  ;;  %v538_v19 = vmul.f32 1.442695, %v501_v16  ;;  %v330_v55 = vld [vmem:[%s1508_s30 + $0x8] sm:$0xff] }
  0xf1   : > { %601 = vadd.xlane.f32.xlu1 %v1457_v57  ;;  %1181 = vpow2.f32 %v544_v59  ;;  %v1178_v0 = vpop.eup %1177  ;;  %v1469_v2 = vmul.f32 %v1176_v62, %v1438_v28 }
  0xf2   : > { %577 = vadd.xlane.f32.xlu0 %v1460_v60  ;;  %1183 = vpow2.f32 %v536_v61  ;;  %v1475_v8 = vmul.f32 %v1178_v0, %v1438_v28 }
  0xf3   : > { %585 = vadd.xlane.f32.xlu2 %v1464_v63 }
  0xf5   : > { %v511_v1 = vpop.f32.mrf.mxu2  ;;  %v521_v6 = vpop.f32.mrf.mxu3 }
  0xf6   : > { %v546_v4 = vmul.f32 1.442695, %v511_v1  ;;  %v1180_v5 = vpop.eup %1179  ;;  %v554_v12 = vmul.f32 1.442695, %v521_v6  ;;  %v338_v6 = vld [vmem:[%s1508_s30 + $0x48] sm:$0xff] }
  0xf7   : > { %v1472_v7 = vmul.f32 %v1180_v5, %v1438_v28  ;;  %v1182_v10 = vpop.eup %1181  ;;  %v334_v5 = vld [vmem:[%s1508_s30 + $0x28] sm:$0xff] }
  0xf8   : > { %1185 = vpow2.f32 %v546_v4  ;;  %v1184_v11 = vpop.eup %1183  ;;  %v1481_v13 = vmul.f32 %v1182_v10, %v1438_v28 }
  0xf9   : > { %579 = vadd.xlane.f32.xlu1 %v1469_v2  ;;  %1187 = vpow2.f32 %v530_v9  ;;  %v1484_v15 = vmul.f32 %v1184_v11, %v1438_v28 }
  0xfa   : > { %593 = vadd.xlane.f32.xlu0 %v1475_v8  ;;  %1189 = vpow2.f32 %v554_v12 }
  0xfb   : > { %603 = vadd.xlane.f32.xlu2 %v1472_v7  ;;  %1191 = vpow2.f32 %v538_v19 }
  0xfe   : > { %v1186_v14 = vpop.eup %1185 }
  0xff   : > { %v1487_v17 = vmul.f32 %v1186_v14, %v1438_v28  ;;  %v1188_v18 = vpop.eup %1187 }
 0x100   : > { %v1190_v20 = vpop.eup %1189  ;;  %v1493_v21 = vmul.f32 %v1188_v18, %v1438_v28 }
 0x101   : > { %595 = vadd.xlane.f32.xlu1 %v1481_v13  ;;  %v1496_v22 = vmul.f32 %v1190_v20, %v1438_v28  ;;  %v1192_v23 = vpop.eup %1191 }
 0x102   : > { %587 = vadd.xlane.f32.xlu0 %v1484_v15  ;;  %v1501_v24 = vmul.f32 %v1192_v23, %v1438_v28  ;;  %v329_v28 = vld [vmem:[%s1508_s30] sm:$0xff]  ;;  %v331_v23 = vld [vmem:[%s1508_s30 + $0x10] sm:$0xff] }
 0x103   : > { %597 = vadd.xlane.f32.xlu2 %v1487_v17 }
 0x109   : > { %581 = vadd.xlane.f32.xlu1 %v1493_v21 }
 0x10a   : > { %605 = vadd.xlane.f32.xlu0 %v1496_v22 }
 0x111   : > { %589 = vadd.xlane.f32.xlu1 %v1501_v24 }
 0x155   : > { %v576_v26 = vpop.xlane.xlu0 %575 }
 0x156   : > { %v584_v27 = vpop.xlane.xlu2 %583  ;;  %v607_v29 = vadd.f32 1e-10, %v576_v26 }
 0x157   : > { %v611_v30 = vadd.f32 1e-10, %v584_v27  ;;  %v335_v27 = vld [vmem:[%s1508_s30 + $0x30] sm:$0xff] }
 0x158   : > { %1193 = vrcp.f32 %v607_v29 }
 0x159   : > { %1195 = vrcp.f32 %v611_v30 }
 0x15d   : > { %v600_v31 = vpop.xlane.xlu0 %599 }
 0x15e   : > { %v1194_v32 = vpop.eup %1193  ;;  %v619_v33 = vadd.f32 1e-10, %v600_v31  ;;  %v592_v34 = vpop.xlane.xlu2 %591 }
 0x15f   : > { %v639_v35 = vmul.f32 %v1194_v32, %v329_v28  ;;  %v615_v38 = vadd.f32 1e-10, %v592_v34  ;;  %v1196_v39 = vpop.eup %1195 }
 0x160   : > { %1197 = vrcp.f32 %v619_v33  ;;  %v643_v44 = vmul.f32 %v1196_v39, %v333_v40  ;;  %v332_v39 = vld [vmem:[%s1508_s30 + $0x18] sm:$0xff] }
 0x161   : > { %657 = vperm.xlu1 %1157, %v639_v35   ;;  %1199 = vrcp.f32 %v615_v38 }
 0x164   : > { %v1512_v41 = vpop.xlane.xlu1 %601 }
 0x165   : > { %v578_v43 = vpop.xlane.xlu0 %577 }
 0x166   : > { %v1198_v45 = vpop.eup %1197  ;;  %v608_v47 = vadd.f32 1e-10, %v578_v43  ;;  %v586_v48 = vpop.xlane.xlu2 %585  ;;  %v344_v43 = vld [vmem:[%s1508_s30 + $0x78] sm:$0xff] }
 0x167   : > { %v651_v50 = vmul.f32 %v1198_v45, %v341_v42  ;;  %v1200_v51 = vpop.eup %1199  ;;  %v612_v52 = vadd.f32 1e-10, %v586_v48 }
 0x168   : > { %1201 = vrcp.f32 %v608_v47  ;;  %v647_v58 = vmul.f32 %v1200_v51, %v337_v53  ;;  %v340_v47 = vld [vmem:[%s1508_s30 + $0x58] sm:$0xff]  ;;  %v620_v53 = vadd.f32 1e-10, %v1512_v41 }
 0x169   : > { %717 = vperm.xlu0 %1158, %v651_v50   ;;  %677 = vperm.xlu1 %1157, %v643_v44   ;;  %1203 = vrcp.f32 %v612_v52 }
 0x16c   : > { %v580_v54 = vpop.xlane.xlu1 %579 }
 0x16d   : > { %v594_v56 = vpop.xlane.xlu0 %593  ;;  %v609_v1 = vadd.f32 1e-10, %v580_v54 }
 0x16e   : > { %v1202_v59 = vpop.eup %1201  ;;  %v616_v61 = vadd.f32 1e-10, %v594_v56  ;;  %v604_v62 = vpop.xlane.xlu2 %603 }
 0x16f   : > { %v640_v0 = vmul.f32 %v1202_v59, %v330_v55  ;;  %v1204_v3 = vpop.eup %1203  ;;  %v621_v38 = vadd.f32 1e-10, %v604_v62  ;;  %v336_v55 = vld [vmem:[%s1508_s30 + $0x38] sm:$0xff] }
 0x170   : > { %1205 = vrcp.f32 %v616_v61  ;;  %v644_v16 = vmul.f32 %v1204_v3, %v334_v5 }
 0x171   : > { %662 = vperm.xlu2 %1159, %v640_v0   ;;  %697 = vperm.xlu1 %1157, %v647_v58   ;;  %1207 = vrcp.f32 %v609_v1  ;;  %v343_v58 = vld [vmem:[%s1508_s30 + $0x70] sm:$0xff]  ;;  %v342_v0 = vld [vmem:[%s1508_s30 + $0x68] sm:$0xff] }
 0x174   : > { %v596_v4 = vpop.xlane.xlu1 %595 }
 0x175   : > { %v617_v9 = vadd.f32 1e-10, %v596_v4  ;;  %v588_v10 = vpop.xlane.xlu0 %587 }
 0x176   : > { %v1206_v11 = vpop.eup %1205  ;;  %v613_v12 = vadd.f32 1e-10, %v588_v10  ;;  %v598_v14 = vpop.xlane.xlu2 %597 }
 0x177   : > { %1209 = vrcp.f32 %v617_v9  ;;  %v648_v18 = vmul.f32 %v1206_v11, %v338_v6  ;;  %v1208_v19 = vpop.eup %1207  ;;  %v618_v20 = vadd.f32 1e-10, %v598_v14 }
 0x178   : > { %1211 = vrcp.f32 %v613_v12  ;;  %v641_v31 = vmul.f32 %v1208_v19, %v331_v23 }
 0x179   : > { %682 = vperm.xlu2 %1159, %v644_v16   ;;  %702 = vperm.xlu0 %1158, %v648_v18   ;;  %1213 = vrcp.f32 %v618_v20 }
 0x17c   : > { %v582_v26 = vpop.xlane.xlu1 %581 }
 0x17d   : > { %v1210_v29 = vpop.eup %1209  ;;  %v610_v30 = vadd.f32 1e-10, %v582_v26  ;;  %v606_v28 = vpop.xlane.xlu0 %605 }
 0x17e   : > { %v1212_v32 = vpop.eup %1211  ;;  %v622_v33 = vadd.f32 1e-10, %v606_v28  ;;  %v649_v34 = vmul.f32 %v1210_v29, %v339_v25 }
 0x17f   : > { %1215 = vrcp.f32 %v610_v30  ;;  %v645_v35 = vmul.f32 %v1212_v32, %v335_v27  ;;  %v1214_v40 = vpop.eup %1213 }
 0x180   : > { %1217 = vrcp.f32 %v622_v33  ;;  %v650_v52 = vmul.f32 %v1214_v40, %v340_v47 }
 0x181   : > { %667 = vperm.xlu0 %1158, %v641_v31   ;;  %707 = vperm.xlu2 %1159, %v649_v34   ;;  %1219 = vrcp.f32 %v621_v38 }
 0x182   : > { %687 = vperm.xlu1 %1157, %v645_v35  }
 0x184   : > { %v590_v42 = vpop.xlane.xlu1 %589 }
 0x185   : > { %v1216_v44 = vpop.eup %1215  ;;  %v614_v45 = vadd.f32 1e-10, %v590_v42 }
 0x186   : > { %v1218_v48 = vpop.eup %1217  ;;  %v642_v50 = vmul.f32 %v1216_v44, %v332_v39 }
 0x187   : > { %1221 = vrcp.f32 %v614_v45  ;;  %v654_v51 = vmul.f32 %v1218_v48, %v344_v43  ;;  %v1220_v54 = vpop.eup %1219 }
 0x188   : > { %1223 = vrcp.f32 %v620_v53  ;;  %v653_v61 = vmul.f32 %v1220_v54, %v343_v58 }
 0x189   : > { %732 = vperm.xlu0 %1158, %v654_v51   ;;  %672 = vperm.xlu2 %1159, %v642_v50  }
 0x18a   : > { %712 = vperm.xlu1 %1157, %v650_v52  }
 0x18d   : > { %v1222_v56 = vpop.eup %1221 }
 0x18e   : > { %v646_v59 = vmul.f32 %v1222_v56, %v336_v55  ;;  %v1224_v62 = vpop.eup %1223 }
 0x18f   : > { %v652_v1 = vmul.f32 %v1224_v62, %v342_v0 }
 0x191   : > { %692 = vperm.xlu2 %1159, %v646_v59  }
 0x192   : > { %727 = vperm.xlu1 %1157, %v653_v61  }
 0x199   : > { %722 = vperm.xlu2 %1159, %v652_v1  }
 0x1cb   : > { %v663_v3 = vpop.permute.xlu2 %662 }
 0x1cc   : > { %v736_v5 = vmul.f32 %v663_v3, %v1460_v60 }
 0x1d3   : > { %v683_v41 = vpop.permute.xlu2 %682  ;;  %v658_v4 = vpop.permute.xlu1 %657 }
 0x1d4   : > { %v735_v6 = vmul.f32 %v658_v4, %v1441_v36  ;;  %v740_v12 = vmul.f32 %v683_v41, %v1464_v63 }
 0x1d6   : > { %v1031_v9 = vpack.c.bf16 %v736_v5, %v735_v6 }
 0x1d8   : > { %1032 = vst [vmem:[%s1534_s6] sm:$0xff] %v1031_v9  }
 0x1db   : > { %v708_v10 = vpop.permute.xlu2 %707  ;;  %v678_v11 = vpop.permute.xlu1 %677 }
 0x1dc   : > { %v739_v14 = vmul.f32 %v678_v11, %v1444_v37  ;;  %v718_v18 = vpop.permute.xlu0 %717 }
 0x1dd   : > { %v747_v37 = vmul.f32 %v718_v18, %v1449_v46 }
 0x1de   : > { %v1041_v16 = vpack.c.bf16 %v740_v12, %v739_v14 }
 0x1e0   : > { %1069 = vst [vmem:[%s1534_s6 + $0x10] sm:$0xff] %v1041_v16  }
 0x1e3   : > { %v673_v19 = vpop.permute.xlu2 %672  ;;  %v698_v60 = vpop.permute.xlu1 %697 }
 0x1e4   : > { %v743_v23 = vmul.f32 %v698_v60, %v1452_v49  ;;  %v738_v29 = vmul.f32 %v673_v19, %v1493_v21  ;;  %v745_v21 = vmul.f32 %v708_v10, %v1481_v13 }
 0x1eb   : > { %v703_v20 = vpop.permute.xlu0 %702  ;;  %v693_v36 = vpop.permute.xlu2 %692 }
 0x1ec   : > { %v744_v25 = vmul.f32 %v703_v20, %v1475_v8  ;;  %v742_v31 = vmul.f32 %v693_v36, %v1501_v24 }
 0x1ee   : > { %v1051_v26 = vpack.c.bf16 %v744_v25, %v743_v23 }
 0x1f0   : > { %1071 = vst [vmem:[%s1534_s6 + $0x20] sm:$0xff] %v1051_v26  }
 0x1f3   : > { %v668_v27 = vpop.permute.xlu0 %667  ;;  %v723_v63 = vpop.permute.xlu2 %722 }
 0x1f4   : > { %v737_v30 = vmul.f32 %v668_v27, %v1469_v2  ;;  %v748_v28 = vmul.f32 %v723_v63, %v1457_v57  ;;  %v688_v49 = vpop.permute.xlu1 %687 }
 0x1f5   : > { %v741_v8 = vmul.f32 %v688_v49, %v1484_v15 }
 0x1f6   : > { %v1036_v32 = vpack.c.bf16 %v738_v29, %v737_v30  ;;  %v1061_v33 = vpack.c.bf16 %v748_v28, %v747_v37 }
 0x1f7   : > { %v1046_v34 = vpack.c.bf16 %v742_v31, %v741_v8 }
 0x1f8   : > { %1068 = vst [vmem:[%s1534_s6 + $0x8] sm:$0xff] %v1036_v32  }
 0x1f9   : > { %1073 = vst [vmem:[%s1534_s6 + $0x30] sm:$0xff] %v1061_v33  }
 0x1fa   : > { %1070 = vst [vmem:[%s1534_s6 + $0x18] sm:$0xff] %v1046_v34  }
 0x1fb   : > { %v733_v15 = vpop.permute.xlu0 %732 }
 0x1fc   : > { %v713_v46 = vpop.permute.xlu1 %712  ;;  %v750_v35 = vmul.f32 %v733_v15, %v1496_v22 }
 0x1fd   : > { %v746_v57 = vmul.f32 %v713_v46, %v1487_v17 }
 0x1ff   : > { %v1056_v2 = vpack.c.bf16 %v746_v57, %v745_v21 }
 0x201   : > { %1072 = vst [vmem:[%s1534_s6 + $0x28] sm:$0xff] %v1056_v2  }
 0x204   : > { %v728_v24 = vpop.permute.xlu1 %727 }
 0x205   : > { %v749_v38 = vmul.f32 %v728_v24, %v1472_v7 }
 0x207   : > { %v1066_v13 = vpack.c.bf16 %v750_v35, %v749_v38 }
 0x209   : > { %1074 = vst [vmem:[%s1534_s6 + $0x38] sm:$0xff] %v1066_v13  }
 0x20a   : > { %1252 = shalt.err (!%p1249_p5)
}
 0x20b   : > { %s1306_s29 = smov 64   ;;  %s1307_s5 = smov 4  }
 0x20c   : > { %1099 = dma.vmem_to_hbm [thread:$0]  (%p1373_p4), %s799_s11, 1024, %s801_s12, %s784_s18, %s1306_s29, %s1306_s29, %s1307_s5  }
 0x20d PF: > { %p1105_p6 = scmp.ge.s32.totalorder %s1303_s20, 2  ;;  %s815_s6 = sand.u32 1, %s1283_s15  }
 0x20e   : > { %s816_s7 = scalar_lea.sflag [#allocation3], %s815_s6 }
 0x20f   : > { %p1102_p7 = pnand %p1105_p6, %p1380_p8 }
 0x211   : > { %p1103_p9 = pneg %p1102_p7 }
 0x213   : > { %1278 = dma.done.wait (%p1103_p9), %s816_s7, 1024  }
 0x214   : > { %1280 = vsyncadd (%p1103_p9), %s816_s7, 4294966272  ;;  %s17_s20 = sadd.s32 1, %s1303_s20   ;;  %s1604_s15 = smov %s1287_s16 }
 0x215   : > { %p14_p10 = scmp.ge.s32.totalorder %s17_s20, 4   ;;  %s1605_s16 = smov %s1291_s17 }
 0x216   : > { %s1606_s17 = smov %s1386_s28  ;;  %s1607_s18 = smov %s1299_s19 }
 0x217   : > { %s1608_s19 = smov %s1610_s23  ;;  %16 = sbr.rel (!%p14_p10) target bundleno = 4 (0x4), region = 80 }
 0x21c   :  { %822 = vsyncpa [#allocation3], 1 }
 0x21d   :  { %824 = vsyncpa [#allocation3 + $0x1], 1 }

</bundles_post_ra>
